<compile_context>
chip_gen: v5e
topology: v5e:2x2
jax: 0.10.0
libtpu: 0.0.40
codegen_flags: <defaults>
</compile_context>

<pallas_src>
import math

import jax
import jax.numpy as jnp
from jax.experimental import pallas as pl
from jax.experimental.pallas import tpu as pltpu


# ----------------------------------------------------------------------------
# Buffer setup (plain JAX glue, mirrors nn.Module.__init__; runs once)
# ----------------------------------------------------------------------------
def create_positional_encoding_1d(max_len: int, hidden_dim: int) -> jnp.ndarray:
    position = jnp.arange(max_len, dtype=jnp.float32)[:, None]            # (L, 1)
    div_term = jnp.exp(
        jnp.arange(0, hidden_dim, 2, dtype=jnp.float32)
        * (-math.log(10000.0) / hidden_dim)
    )                                                                      # (D/2,)
    pe = jnp.zeros((max_len, hidden_dim), dtype=jnp.float32)
    pe = pe.at[:, 0::2].set(jnp.sin(position * div_term))
    pe = pe.at[:, 1::2].set(jnp.cos(position * div_term))
    return pe                                                              # (L, D)


def create_positional_encoding_2d(hidden_dim: int, height: int, width: int) -> jnp.ndarray:
    """Builds the (1, hidden_dim, height, width) buffer registered in __init__."""
    assert hidden_dim % 2 == 0, "Hidden dimension must be divisible by 2."
    d2 = hidden_dim // 2
    pe_h = create_positional_encoding_1d(height, d2)                      # (H, D/2)
    pe_w = create_positional_encoding_1d(width, d2)                       # (W, D/2)
    pe_h = jnp.broadcast_to(pe_h.T[:, :, None], (d2, height, width))      # (D/2, H, W)
    pe_w = jnp.broadcast_to(pe_w.T[:, None, :], (d2, height, width))      # (D/2, H, W)
    pe = jnp.concatenate([pe_h, pe_w], axis=0)                            # (D, H, W)
    return pe[None]                                                       # (1, D, H, W)


def prepare_pe(pe: jnp.ndarray, H: int, W: int, dtype) -> jnp.ndarray:
    """Init-time prep (cached per (H, W, dtype)): slice the buffer to the
    actual (H, W), cast to the model dtype, flatten the spatial dims."""
    _, C, Hm, Wm = pe.shape
    assert H <= Hm and W <= Wm, "requested spatial size exceeds pe buffer"
    return pe[0, :, :H, :W].astype(dtype).reshape(C, H * W)               # (C, H*W)


# ----------------------------------------------------------------------------
# Pallas kernel: lane-dense broadcast-add of the positional encoding
# ----------------------------------------------------------------------------
def _add_pe_kernel(x_ref, pe_ref, o_ref):
    # 2-D path: x/o (b_block, f_block), pe (1, f_block)  -> sublane broadcast.
    # 3-D path: x/pe/o all (1, c_block, hw_block)        -> plain add.
    o_ref[...] = x_ref[...] + pe_ref[...]


# ----------------------------------------------------------------------------
# Tiling helpers
# ----------------------------------------------------------------------------
_MAX_BLOCK_BYTES = 4 * 1024 * 1024    # per x/out block (review: 4-6 MiB sweet spot)


def _sublane_pack(dtype) -> int:
    """Rows per sublane-packed tile: 8 for 4-byte, 16 for 2-byte, 32 for 1-byte."""
    return {4: 8, 2: 16, 1: 32}.get(jnp.dtype(dtype).itemsize, 8)


def _choose_batch_block(B: int, sub: int, cap: int = 64) -> int:
    """Largest divisor of B that is a multiple of `sub`, capped at `cap`."""
    best = sub
    d = sub
    while d <= min(B, cap):
        if B % d == 0:
            best = d
        d += sub
    return best


def _choose_aligned_block(dim: int, align: int, bytes_per_elem: int, budget: int) -> int:
    """Largest multiple of `align` dividing `dim` with block*bytes_per_elem <= budget.
    Falls back to the full dim (a full-extent block is always layout-legal)."""
    if dim % align != 0:
        return dim
    max_elems = max(align, budget // max(1, bytes_per_elem))
    m = dim // align
    best = 1
    for d in range(1, m + 1):
        if m % d == 0 and align * d <= max_elems:
            best = d
    return align * best


def _vmem_limit(needed_bytes: int) -> int:
    """Scoped-VMEM limit: above every generation's default so the enlarged
    blocks double-buffer, capped at 48 MiB (safe under v7x's 64 MiB physical)."""
    return int(min(max(32 * 1024 * 1024, needed_bytes + 4 * 1024 * 1024),
                   48 * 1024 * 1024))


# ----------------------------------------------------------------------------
# Forward pass
# ----------------------------------------------------------------------------
def positional_encoding_2d_forward(x: jnp.ndarray, pe_chw: jnp.ndarray,
                                   *, donate_input: bool = False) -> jnp.ndarray:
    """out = x + pe (pe pre-sliced/cast/flattened to (C, H*W) by prepare_pe).

    x: (B, C, H, W); pe_chw: (C, H*W), same dtype as x.
    donate_input=True aliases the x buffer to the output (only use when x is
    donated inside the enclosing jit, otherwise XLA inserts a defensive copy).
    """
    B, C, H, W = x.shape
    HW = H * W
    F = C * HW
    assert pe_chw.shape == (C, HW), "pe_chw does not match x's (C, H, W)"
    assert pe_chw.dtype == x.dtype, "prepare_pe with the model dtype first"

    itemsize = jnp.dtype(x.dtype).itemsize
    sub = _sublane_pack(x.dtype)
    io_alias = {0: 0} if donate_input else {}
    cost = pl.CostEstimate(flops=B * F, transcendentals=0,
                           bytes_accessed=(2 * B + 1) * F * itemsize)

    # TODO(synk): for very small batches the pe stream could be generated
    # in-kernel (iota + sin/cos on idle EUP/VPU slots) to drop its HBM read.

    if B % sub == 0 and F % 128 == 0:
        # ---- 2-D lane-dense path: x/out (B, F), pe (1, F) ------------------
        b_block = _choose_batch_block(B, sub)
        f_block = _choose_aligned_block(F, 128, b_block * itemsize, _MAX_BLOCK_BYTES)
        # v7x megacore: keep >=2 blocks on the parallel flat axis when large.
        if f_block == F and F % 256 == 0 and b_block * f_block * itemsize >= 512 * 1024:
            f_block = F // 2

        x2 = x.reshape(B, F)           # metadata-only for contiguous NCHW input
        pe2 = pe_chw.reshape(1, F)
        grid = (F // f_block, B // b_block)   # flat outer, batch inner -> pe block reused
        needed = 2 * (2 * b_block * f_block + f_block) * itemsize

        out2 = pl.pallas_call(
            _add_pe_kernel,
            out_shape=jax.ShapeDtypeStruct((B, F), x.dtype),
            grid=grid,
            in_specs=[
                pl.BlockSpec((b_block, f_block), lambda f, b: (b, f)),   # x
                pl.BlockSpec((1, f_block), lambda f, b: (0, f)),         # pe (bcast)
            ],
            out_specs=pl.BlockSpec((b_block, f_block), lambda f, b: (b, f)),
            compiler_params=pltpu.CompilerParams(
                dimension_semantics=("parallel", "parallel"),
                vmem_limit_bytes=_vmem_limit(needed)),
            cost_estimate=cost,
            input_output_aliases=io_alias,
        )(x2, pe2)
        return out2.reshape(B, C, H, W)

    # ---- 3-D path: x/out (B, C, HW), pe (1, C, HW) -------------------------
    # Handles small / unaligned batch (e.g. B=2) with full (8,128) tiles on
    # (C, HW), and unaligned C*H*W via padding of the spatial axis only.
    HW_p = ((HW + 127) // 128) * 128
    x3 = x.reshape(B, C, HW)
    pe3 = pe_chw[None]                                                     # (1, C, HW)
    if HW_p != HW:
        # TODO(synk): padding costs one extra pass over x; acceptable fallback
        # for ragged spatial sizes — keeps tiling legal and stores unmasked.
        pad = HW_p - HW
        x3 = jnp.pad(x3, ((0, 0), (0, 0), (0, pad)))
        pe3 = jnp.pad(pe3, ((0, 0), (0, 0), (0, pad)))

    hw_block = _choose_aligned_block(HW_p, 128, C * itemsize, _MAX_BLOCK_BYTES)
    if hw_block == HW_p and HW_p % 256 == 0 and C * hw_block * itemsize >= 512 * 1024:
        hw_block = HW_p // 2          # give v7x's second TC something to do

    grid = (HW_p // hw_block, B)      # hw outer, batch inner -> pe block reused
    needed = 2 * (3 * C * hw_block) * itemsize

    out3 = pl.pallas_call(
        _add_pe_kernel,
        out_shape=jax.ShapeDtypeStruct((B, C, HW_p), x.dtype),
        grid=grid,
        in_specs=[
            pl.BlockSpec((1, C, hw_block), lambda hw, b: (b, 0, hw)),     # x
            pl.BlockSpec((1, C, hw_block), lambda hw, b: (0, 0, hw)),     # pe
        ],
        out_specs=pl.BlockSpec((1, C, hw_block), lambda hw, b: (b, 0, hw)),
        compiler_params=pltpu.CompilerParams(
            dimension_semantics=("parallel", "parallel"),
            vmem_limit_bytes=_vmem_limit(needed)),
        cost_estimate=cost,
        input_output_aliases=io_alias,
    )(x3, pe3)
    if HW_p != HW:
        out3 = out3[:, :, :HW]
    return out3.reshape(B, C, H, W)


# ----------------------------------------------------------------------------
# Module-like wrapper (mirrors the PyTorch nn.Module; caches prepped pe so
# calls with different (H, W) / dtypes stay correct, matching the per-call
# slicing done by the reference forward()).
# ----------------------------------------------------------------------------
class PositionalEncoding2D:
    def __init__(self, hidden_dim: int, height: int, width: int):
        assert hidden_dim % 2 == 0, "Hidden dimension must be divisible by 2."
        self.hidden_dim = hidden_dim
        self.pe = create_positional_encoding_2d(hidden_dim, height, width)  # (1,C,H,W) f32
        self._prepared = {}

    def _pe_for(self, H: int, W: int, dtype) -> jnp.ndarray:
        key = (H, W, jnp.dtype(dtype).name)
        if key not in self._prepared:
            self._prepared[key] = prepare_pe(self.pe, H, W, dtype)
        return self._prepared[key]

    def __call__(self, x: jnp.ndarray) -> jnp.ndarray:
        pe_chw = self._pe_for(x.shape[2], x.shape[3], x.dtype)
        return positional_encoding_2d_forward(x, pe_chw)


# ----------------------------------------------------------------------------
# Pure-JAX reference for correctness check
# ----------------------------------------------------------------------------
def positional_encoding_2d_ref(x: jnp.ndarray, pe: jnp.ndarray) -> jnp.ndarray:
    return x + pe[:, :, : x.shape[2], : x.shape[3]].astype(x.dtype)


if __name__ == "__main__":
    hidden_dim = 8       # channel dim of the feature map (must be even)
    height, width = 16, 16

    module = PositionalEncoding2D(hidden_dim, height, width)
    key = jax.random.PRNGKey(0)

    # Case 1: small batch (B=2) -> exercises the 3-D (B, C, H*W) path.
    x_small = jax.random.normal(key, (2, hidden_dim, height, width), dtype=jnp.float32)
    out_small = jax.block_until_ready(module(x_small))
    ref_small = positional_encoding_2d_ref(x_small, module.pe)
    assert out_small.shape == x_small.shape and out_small.dtype == x_small.dtype
    assert jnp.allclose(out_small, ref_small, atol=1e-6, rtol=1e-6), \
        "Pallas output mismatch vs reference (3-D path)"

    # Case 2: sublane-aligned batch (B=8) -> exercises the 2-D lane-dense path.
    x_big = jax.random.normal(jax.random.PRNGKey(0),
                              (8, hidden_dim, height, width), dtype=jnp.float32)
    out_big = jax.block_until_ready(module(x_big))
    ref_big = positional_encoding_2d_ref(x_big, module.pe)
    assert out_big.shape == x_big.shape and out_big.dtype == x_big.dtype
    assert jnp.allclose(out_big, ref_big, atol=1e-6, rtol=1e-6), \
        "Pallas output mismatch vs reference (2-D path)"

    print("KERNEL_OK")
</pallas_src>

<mosaic_0001>
module attributes {stable_mosaic.version = 11 : i64} {
  func.func @_add_pe_kernel(%arg0: i32, %arg1: i32, %arg2: memref<1x8x256xf32, #tpu.memory_space<vmem>>, %arg3: memref<1x8x256xf32, #tpu.memory_space<vmem>>, %arg4: memref<1x8x256xf32, #tpu.memory_space<vmem>>) attributes {dimension_semantics = [#tpu.dimension_semantics<parallel>, #tpu.dimension_semantics<parallel>], iteration_bounds = array<i64: 1, 2>, scalar_prefetch = 0 : i64, scratch_operands = 0 : i64, tpu.core_type = #tpu.core_type<tc>, window_params = [{transform_indices = @transform_0, window_bounds = array<i64: 1, 8, 256>}, {transform_indices = @transform_1, window_bounds = array<i64: 1, 8, 256>}, {transform_indices = @transform_2, window_bounds = array<i64: 1, 8, 256>}]} {
    %c0 = arith.constant 0 : index
    %c0_0 = arith.constant 0 : index
    %c0_1 = arith.constant 0 : index
    %0 = vector.load %arg2[%c0, %c0_0, %c0_1] : memref<1x8x256xf32, #tpu.memory_space<vmem>>, vector<1x8x256xf32>
    %c0_2 = arith.constant 0 : index
    %c0_3 = arith.constant 0 : index
    %c0_4 = arith.constant 0 : index
    %1 = vector.load %arg3[%c0_2, %c0_3, %c0_4] : memref<1x8x256xf32, #tpu.memory_space<vmem>>, vector<1x8x256xf32>
    %2 = arith.addf %0, %1 : vector<1x8x256xf32>
    %c0_5 = arith.constant 0 : index
    %c0_6 = arith.constant 0 : index
    %c0_7 = arith.constant 0 : index
    %3 = vector.load %arg4[%c0_5, %c0_6, %c0_7] : memref<1x8x256xf32, #tpu.memory_space<vmem>>, vector<1x8x256xf32>
    tpu.vector_store %arg4[%c0_5, %c0_6, %c0_7], %2 {strides = array<i32>} : memref<1x8x256xf32, #tpu.memory_space<vmem>>, vector<1x8x256xf32>,
    return
  }
  func.func @transform_0(%arg0: i32, %arg1: i32) -> (i32, i32, i32) {
    %c0_i32 = arith.constant 0 : i32
    %c0_i32_0 = arith.constant 0 : i32
    return %arg1, %c0_i32, %arg0 : i32, i32, i32
  }
  func.func @transform_1(%arg0: i32, %arg1: i32) -> (i32, i32, i32) {
    %c0_i32 = arith.constant 0 : i32
    %c0_i32_0 = arith.constant 0 : i32
    %c0_i32_1 = arith.constant 0 : i32
    return %c0_i32, %c0_i32_0, %arg0 : i32, i32, i32
  }
  func.func @transform_2(%arg0: i32, %arg1: i32) -> (i32, i32, i32) {
    %c0_i32 = arith.constant 0 : i32
    %c0_i32_0 = arith.constant 0 : i32
    return %arg1, %c0_i32, %arg0 : i32, i32, i32
  }
}

</mosaic_0001>

<bundles_post_ra>
// kernel: tpu_custom_call.1
= control target key start
LH: loop header
LB: loop body
LE: loop exit
PB: predicated region body
PF: predicated region fallthrough
CT: control target
= control target key end

     0   :  { %7 = vsyncpa [#allocation3], 0  ;;  %s734_s0 = inlined_call_operand.hbm [shape: f32[2,8,256], index: 0, kind: input, shape index: {}]   ;;  %s735_s1 = inlined_call_operand.hbm [shape: f32[1,8,256], index: 1, kind: input, shape index: {}]   ;;  %s736_s2 = inlined_call_operand.hbm [shape: f32[2,8,256], index: 2, kind: output, shape index: {}]  }
   0x1   :  { %9 = vsyncpa [#allocation3 + $0x1], 0 }
   0x2   :  { %10 = vsyncpa [#allocation6], 0 }
   0x3   :  { %11 = vsyncpa [#allocation4], 0 }
   0x4   :  { %13 = vsyncpa [#allocation4 + $0x1], 0  ;;  %s585_s9 = smov 0   ;;  %s587_s10 = smov 0  }
   0x5   :  { %s589_s11 = smov 0   ;;  %s591_s12 = smov 0  }
   0x6   :  { %s593_s13 = smov 0   ;;  %s595_s14 = smov 0  }
   0x7 LB: > { %s329_s15 = sadd.s32 4294967295, %s567_s14   ;;  %s330_s16 = sadd.s32 4294967294, %s567_s14   ;;  %s567_s14 = sphi %s595_s14, %s19_s14   ;;  %s563_s13 = sphi %s593_s13, %s748_s13   ;;  %s559_s12 = sphi %s591_s12, %s747_s12   ;;  %s555_s11 = sphi %s589_s11, %s746_s11   ;;  %s551_s10 = sphi %s587_s10, %s745_s10   ;;  %s547_s9 = sphi %s585_s9, %s744_s9  }
   0x8   : > { %p53_p0 = scmp.ne.s32.totalorder %s551_s10, %s547_s9  ;;  %p619_p1 = scmp.eq.s32.totalorder %s329_s15, 0 }
   0x9   : > { %p623_p2 = scmp.eq.s32.totalorder %s329_s15, 1  ;;  %p111_p3 = scmp.eq.s32.totalorder %s330_s16, 1 }
   0xa   : > { %p629_p4 = por %p619_p1, %p53_p0  ;;  %p331_p5 = scmp.ge.s32.totalorder %s567_s14, 1 }
   0xb   : > { %p634_p6 = por %p111_p3, %p53_p0  ;;  %p118_p7 = scmp.lt.s32.totalorder %s567_s14, 3 }
   0xc   : > { %s133_s23 = sshll.u32 %s735_s1, 4  ;;  %p333_p9 = scmp.ge.s32.totalorder %s567_s14, 2  ;;  %s134_s23 = int_to_ptr.hbm [resolvable:$true] %s133_s23 }
   0xd   : > { %p642_p8 = pnand %p331_p5, %p118_p7  ;;  %s569_s25 = smov [#allocation5]  }
   0xe   : > { %s135_s26 = sshll.u32 %s569_s25, 4  ;;  %s28_s27 = sadd.s32 1, %s563_s13  ;;  %s136_s26 = int_to_ptr.vmem [resolvable:$true] %s135_s26 }
   0xf   : > { %p356_p10 = pneg %p642_p8  ;;  %p29_p12 = scmp.ge.s32.totalorder %s28_s27, 2 }
  0x10   : > { %s40_s28 = sadd.s32 1, %s555_s11  ;;  %p47_p13 = scmp.ne.s32.totalorder %s555_s11, %s551_s10 }
  0x11   : > { %p357_p11 = pnand %p356_p10, %p619_p1  ;;  %p48_p0 = scmp.eq.s32.totalorder %s567_s14, 0 }
  0x12   : > { %s750_s27 = smov (%p29_p12, %s28_s27), 0  ;;  %p664_p5 = por %p623_p2, %p47_p13 }
  0x13   : > { %359 = dma.hbm_to_vmem [thread:$0]  (!%p357_p11), %s134_s23, 256, %s136_s26, [#allocation6]  }
  0x14   : > { %p658_p3 = por %p48_p0, %p47_p13  ;;  %s35_s3 = ssub.s32 %s563_s13, %s750_s27 }
  0x15   : > { %p369_p7 = scmp.lt.s32.totalorder %s567_s14, 2  ;;  %p38_p10 = scmp.eq.s32.totalorder %s35_s3, 0 }
  0x16   : > { %s146_s4 = sand.u32 1, %s555_s11   ;;  %s346_s7 = sshll.u32 %s563_s13, 4 }
  0x17   : > { %s334_s5 = sshll.u32 %s146_s4, 4  ;;  %s157_s16 = scalar_lea.hbm %s734_s0, %s346_s7 }
  0x18   : > { %s673_s6 = scalar_select %p38_p10, %s555_s11, %s40_s28  }
  0x19   : > { %s150_s21 = scalar_lea.vmem [#allocation2], %s334_s5  ;;  %s159_s18 = sshll.u32 %s157_s16, 4  ;;  %s160_s18 = int_to_ptr.hbm [resolvable:$true] %s159_s18 }
  0x1a   : > { %s161_s22 = sshll.u32 %s150_s21, 4  ;;  %p361_p2 = pnand %p369_p7, %p658_p3  ;;  %s162_s22 = int_to_ptr.vmem [resolvable:$true] %s161_s22 }
  0x1b   : > { %s147_s23 = scalar_lea.sflag [#allocation3], %s146_s4  ;;  %170 = sbr.rel (%p642_p8) target bundleno = 50 (0x32), region = 28 }
  0x1c   : > { %363 = dma.hbm_to_vmem [thread:$0]  (!%p361_p2), %s160_s18, 256, %s162_s22, %s147_s23  }
  0x1d   : > { %s684_s25 = sand.u32 (!%p642_p8), 1, %s551_s10  }
  0x1e   : > { %s338_s26 = sshll.u32 (!%p642_p8), %s684_s25, 4  ;;  %s173_s28 = scalar_lea.sflag (!%p642_p8), [#allocation3], %s684_s25 }
  0x1f   : > { %s176_s3 = scalar_lea.vmem (!%p642_p8), [#allocation2], %s338_s26 }
  0x20   : > { %534 = dma.done.wait (%p629_p4), %s173_s28, 256  }
  0x21   : > { %536 = vsyncadd (%p629_p4), %s173_s28, 4294967040 }
  0x22   : > { %538 = dma.done.wait (%p619_p1), [#allocation6], 256  }
  0x23   : > { %540 = vsyncadd (%p619_p1), [#allocation6], 4294967040  ;;  %s347_s24 = sshll.u32 %s559_s12, 4  ;;  %s202_s7 = scalar_lea.vmem [#allocation7], %s338_s26  ;;  %v206_v0 = vld [vmem:[%s176_s3] sm:$0xff]  ;;  %v207_v2 = vld [vmem:[%s176_s3 + $0x8] sm:$0xff] }
  0x24   : > { %s228_s5 = scalar_lea.hbm %s736_s2, %s347_s24  ;;  %s230_s8 = sshll.u32 %s202_s7, 4  ;;  %v208_v1 = vld [vmem:[#allocation5] sm:$0xff]  ;;  %v209_v4 = vld [vmem:[#allocation5 + $0x8] sm:$0xff]  ;;  %s231_s8 = int_to_ptr.vmem [resolvable:$true] %s230_s8 }
  0x25   : > { %s232_s15 = sshll.u32 %s228_s5, 4  ;;  %v210_v3 = vadd.f32 %v208_v1, %v206_v0  ;;  %v211_v5 = vadd.f32 %v209_v4, %v207_v2  ;;  %s215_s17 = scalar_lea.sflag [#allocation4], %s684_s25  ;;  %s233_s15 = int_to_ptr.hbm [resolvable:$true] %s232_s15 }
  0x26   : > { %s495_s12 = sshra.s32 %s233_s15, 4  ;;  %s501_s22 = scalar_lea.hbm %s736_s2, 32  ;;  %s496_s12 = int_to_ptr.hbm [resolvable:$true] %s495_s12 }
  0x27   : > { %212 = vst [vmem:[%s202_s7] sm:$0xff] %v210_v3  ;;  %s497_s19 = scalar_lea.hbm %s496_s12, 16  ;;  %p502_p11 = scmp.lt.s32.totalorder %s496_s12, %s736_s2 }
  0x28   : > { %213 = vst [vmem:[%s202_s7 + $0x8] sm:$0xff] %v211_v5  ;;  %p498_p1 = scmp.ne.s32.totalorder %s496_s12, %s497_s19  ;;  %p503_p12 = scmp.lt.s32.totalorder %s501_s22, %s497_s19 }
  0x2a   : > { %p499_p4 = pnand %p498_p1, %p664_p5  ;;  %p504_p13 = por %p503_p12, %p502_p11 }
  0x2c   : > { %p500_p8 = pneg %p499_p4 }
  0x2e   : > { %p505_p0 = pnand %p504_p13, %p500_p8 }
  0x30   : > { %508 = shalt.err (!%p505_p0)
}
  0x31   : > { %354 = dma.vmem_to_hbm [thread:$0]  (%p664_p5), %s231_s8, 256, %s233_s15, %s215_s17  }
  0x32 PF: > { %s244_s25 = sand.u32 1, %s547_s9   ;;  %p365_p3 = pnand %p333_p9, %p634_p6 }
  0x33   : > { %s245_s26 = scalar_lea.sflag [#allocation4], %s244_s25 }
  0x34   : > { %p366_p7 = pneg %p365_p3 }
  0x36   : > { %542 = dma.done.wait (%p366_p7), %s245_s26, 256  }
  0x37   : > { %544 = vsyncadd (%p366_p7), %s245_s26, 4294967040  ;;  %s19_s14 = sadd.s32 1, %s567_s14   ;;  %s744_s9 = smov %s551_s10 }
  0x38   : > { %p16_p10 = scmp.ge.s32.totalorder %s19_s14, 4   ;;  %s745_s10 = smov %s555_s11 }
  0x39   : > { %s746_s11 = smov %s673_s6  ;;  %s747_s12 = smov %s563_s13 }
  0x3a   : > { %s748_s13 = smov %s750_s27  ;;  %18 = sbr.rel (!%p16_p10) target bundleno = 7 (0x7), region = 78 }
  0x3f   :  { %251 = vsyncpa [#allocation3], 1 }
  0x40   :  { %253 = vsyncpa [#allocation3 + $0x1], 1 }
  0x41   :  { %254 = vsyncpa [#allocation6], 1 }
  0x42   :  { %255 = vsyncpa [#allocation4], 1 }
  0x43   :  { %257 = vsyncpa [#allocation4 + $0x1], 1 }

</bundles_post_ra>
